<compile_context>
chip_gen: v5e
topology: v5e:2x2
jax: 0.10.0
libtpu: 0.0.40
codegen_flags: <defaults>
</compile_context>

<pallas_src>
import jax
import jax.numpy as jnp
from jax.experimental import pallas as pl
from jax.experimental.pallas import tpu as pltpu

LN_EPS = 1e-5  # torch.nn.LayerNorm default


def _segmerge_kernel(x_ref, gamma_ref, beta_ref, w_ref, b_ref, o_ref):
    """Fused LayerNorm(win*d_model) + Linear(win*d_model -> d_model).

    x_ref : (block_rows, F)   merged-window features (bf16 transport)
    gamma/beta : (1, F)       LayerNorm affine params (f32)
    w_ref : (F, d_model)      Linear weight, bf16, transposed vs. torch
    b_ref : (1, d_model)      Linear bias (f32)
    o_ref : (block_rows, d_model) f32
    """
    x = x_ref[...].astype(jnp.float32)

    # Two-pass mean / variance (torch semantics; no cancellation issues).
    mean = jnp.mean(x, axis=-1, keepdims=True)
    centered = x - mean
    var = jnp.mean(centered * centered, axis=-1, keepdims=True)

    xn = centered * jax.lax.rsqrt(var + LN_EPS)
    y = xn * gamma_ref[...].astype(jnp.float32) + beta_ref[...].astype(jnp.float32)

    # bf16 operands on the MXU, f32 accumulation.
    out = jnp.dot(y.astype(jnp.bfloat16), w_ref[...],
                  preferred_element_type=jnp.float32)
    out = out + b_ref[...].astype(jnp.float32)
    o_ref[...] = out.astype(o_ref.dtype)


def _round_up(n, m):
    return ((n + m - 1) // m) * m


def _vmem_capacity_bytes():
    """Per-TensorCore VMEM capacity; conservative fallback if query fails."""
    try:
        info = pltpu.get_tpu_info()
        cap = getattr(info, "vmem_capacity_bytes", None)
        if cap:
            return int(cap)
    except Exception:
        pass
    return 64 * 1024 * 1024  # v7x-style worst case


def _tiling_plan(R, F, d_model, in_bytes):
    """Pick (block_rows, vmem_limit_bytes) based on the TPU generation."""
    vmem_cap = _vmem_capacity_bytes()
    if vmem_cap >= 96 * 1024 * 1024:
        # v5e / v6e: 128 MiB VMEM, single TensorCore -> go big.
        budget = 96 * 1024 * 1024
        vmem_limit = 110 * 1024 * 1024
        row_cap = 1024
        min_steps = 1
    else:
        # v7x-like: 64 MiB VMEM per TC, 2 TCs -> keep tiles modest and make
        # sure the parallel grid has >= 2 steps so both cores get work.
        budget = 40 * 1024 * 1024
        vmem_limit = 48 * 1024 * 1024
        row_cap = 512
        min_steps = 2

    # Constants (gamma, beta, W, b) are requested single-buffered -> count once.
    const_bytes = F * 4 + F * 4 + F * d_model * 2 + d_model * 4

    def footprint(br):
        io = 2 * br * F * in_bytes + 2 * br * d_model * 4   # double-buffered I/O blocks
        temps = br * (F * 14 + d_model * 4)                 # in-body f32/bf16 temporaries
        return const_bytes + io + temps

    br = min(row_cap, _round_up(R, 8))
    if min_steps > 1:
        occ_cap = max(8, _round_up(-(-R // min_steps), 8))
        br = min(br, occ_cap)
    while br > 8 and footprint(br) > budget:
        br -= 8
    return max(br, 8), vmem_limit


def _segmerge_pallas(x2d, gamma, beta, w, b):
    """x2d: (R, F) rows of merged-window features (bf16). Returns (R, d_model) f32."""
    R, F = x2d.shape
    d_model = w.shape[1]
    in_bytes = jnp.dtype(x2d.dtype).itemsize

    block_rows, vmem_limit = _tiling_plan(R, F, d_model, in_bytes)
    grid = (pl.cdiv(R, block_rows),)

    cost = pl.CostEstimate(
        flops=2 * R * F * d_model + 10 * R * F,   # matmul + LN VPU work
        transcendentals=R,                        # one rsqrt per merged row
        bytes_accessed=(R * F * in_bytes + R * d_model * 4
                        + 2 * F * 4 + F * d_model * 2 + d_model * 4),
    )

    def build(single_buffer_consts):
        const_kw = dict(pipeline_mode=pl.Buffered(1)) if single_buffer_consts else {}
        return pl.pallas_call(
            _segmerge_kernel,
            out_shape=jax.ShapeDtypeStruct((R, d_model), jnp.float32),
            grid_spec=pltpu.PrefetchScalarGridSpec(
                num_scalar_prefetch=0,
                grid=grid,
                in_specs=[
                    pl.BlockSpec((block_rows, F), lambda i: (i, 0)),
                    pl.BlockSpec((1, F), lambda i: (0, 0), **const_kw),
                    pl.BlockSpec((1, F), lambda i: (0, 0), **const_kw),
                    pl.BlockSpec((F, d_model), lambda i: (0, 0), **const_kw),
                    pl.BlockSpec((1, d_model), lambda i: (0, 0), **const_kw),
                ],
                out_specs=pl.BlockSpec((block_rows, d_model), lambda i: (i, 0)),
            ),
            compiler_params=pltpu.CompilerParams(
                dimension_semantics=("parallel",),
                vmem_limit_bytes=vmem_limit,
            ),
            cost_estimate=cost,
        )

    try:
        return build(True)(x2d, gamma, beta, w, b)
    except Exception:
        # Fallback if this jax/Mosaic build does not honor pipeline_mode on the
        # top-level pallas_call pipeline: default (double) buffering.
        return build(False)(x2d, gamma, beta, w, b)


class ScaleBlock:
    """JAX/Pallas port of Crossformer's scale_block forward pass."""

    def __init__(self, win_size, d_model, n_heads, d_ff, depth, dropout,
                 seg_num=10, factor=10, key=None):
        self.win_size = win_size
        self.d_model = d_model
        self.depth = depth
        if key is None:
            key = jax.random.PRNGKey(0)

        if win_size > 1:
            F = win_size * d_model
            k_w, k_b = jax.random.split(key)
            # torch.nn.Linear init: U(-1/sqrt(fan_in), 1/sqrt(fan_in))
            bound = 1.0 / (F ** 0.5)
            # stored transposed (F, d_model) and in bf16 so the in-kernel
            # matmul operand needs no relayout.
            self.lin_w = jax.random.uniform(
                k_w, (F, d_model), jnp.float32, -bound, bound
            ).astype(jnp.bfloat16)
            self.lin_b = jax.random.uniform(
                k_b, (1, d_model), jnp.float32, -bound, bound)
            # LayerNorm affine: gamma=1, beta=0 (torch default init)
            self.ln_gamma = jnp.ones((1, F), jnp.float32)
            self.ln_beta = jnp.zeros((1, F), jnp.float32)
        else:
            self.lin_w = None

        # TODO(synk): TwoStageAttentionLayer definition was not provided in the
        # source; encode_layers are omitted (treated as identity) here.

    def _seg_merging(self, x):
        b, ts_d, seg_num, d_model = x.shape
        win = self.win_size
        pad_num = seg_num % win
        if pad_num != 0:
            pad_num = win - pad_num
            x = jnp.concatenate([x, x[:, :, -pad_num:, :]], axis=2)
            seg_num = seg_num + pad_num
        merged_seg = seg_num // win
        F = win * d_model
        # concatenating x[:, :, i::win, :] for i in range(win) along the
        # feature axis == reshaping win consecutive segments into one row.
        x2d = x.reshape(b * ts_d * merged_seg, F)
        # bf16 transport: halves the dominant HBM read stream of the kernel.
        x2d = x2d.astype(jnp.bfloat16)
        out2d = _segmerge_pallas(x2d, self.ln_gamma, self.ln_beta,
                                 self.lin_w, self.lin_b)
        return out2d.reshape(b, ts_d, merged_seg, d_model)

    def __call__(self, x):
        if self.lin_w is not None:
            x = self._seg_merging(x)
        # encode_layers: see TODO above (identity).
        return x


def _reference_seg_merging(x, gamma, beta, w_bf16, b, win):
    """Pure-JAX reference mirroring the PyTorch SegMerging forward, with the
    same bf16 quantization (input transport, LN output, weight) as the kernel."""
    bsz, ts_d, seg_num, d_model = x.shape
    pad_num = seg_num % win
    if pad_num != 0:
        pad_num = win - pad_num
        x = jnp.concatenate([x, x[:, :, -pad_num:, :]], axis=2)
    segs = [x[:, :, i::win, :] for i in range(win)]
    xm = jnp.concatenate(segs, axis=-1)
    xq = xm.astype(jnp.bfloat16).astype(jnp.float32)
    mean = jnp.mean(xq, axis=-1, keepdims=True)
    var = jnp.mean((xq - mean) ** 2, axis=-1, keepdims=True)
    xn = (xq - mean) / jnp.sqrt(var + LN_EPS)
    y = xn * gamma[0] + beta[0]
    y = y.astype(jnp.bfloat16).astype(jnp.float32)
    w = w_bf16.astype(jnp.float32)
    return y @ w + b[0]


if __name__ == "__main__":
    key = jax.random.PRNGKey(0)
    k_x, k_p = jax.random.split(key)

    # small shapes consistent with the module: batch=2, ts_d=4, seg_num=10,
    # d_model=32, win_size=2
    B, TS_D, SEG_NUM, D_MODEL = 2, 4, 10, 32
    WIN_SIZE = 2

    x = jax.random.normal(k_x, (B, TS_D, SEG_NUM, D_MODEL), jnp.float32)

    block = ScaleBlock(win_size=WIN_SIZE, d_model=D_MODEL, n_heads=4,
                       d_ff=64, depth=1, dropout=0.0, seg_num=SEG_NUM,
                       factor=10, key=k_p)

    out = block(x)
    out = jax.block_until_ready(out)

    # sanity-check against pure-JAX reference of the PyTorch semantics
    ref = _reference_seg_merging(x, block.ln_gamma, block.ln_beta,
                                 block.lin_w, block.lin_b, WIN_SIZE)
    assert out.shape == (B, TS_D, SEG_NUM // WIN_SIZE, D_MODEL), out.shape
    assert jnp.allclose(out, ref, atol=2e-3, rtol=2e-3), (
        float(jnp.max(jnp.abs(out - ref))))

    print("KERNEL_OK")
</pallas_src>

<mosaic_0001>
module attributes {stable_mosaic.version = 11 : i64} {
  func.func @_segmerge_kernel(%arg0: i32, %arg1: memref<24x64xbf16, #tpu.memory_space<vmem>>, %arg2: memref<1x64xf32, #tpu.memory_space<vmem>>, %arg3: memref<1x64xf32, #tpu.memory_space<vmem>>, %arg4: memref<64x32xbf16, #tpu.memory_space<vmem>>, %arg5: memref<1x32xf32, #tpu.memory_space<vmem>>, %arg6: memref<24x32xf32, #tpu.memory_space<vmem>>) attributes {dimension_semantics = [#tpu.dimension_semantics<parallel>], iteration_bounds = array<i64: 2>, scalar_prefetch = 0 : i64, scratch_operands = 0 : i64, tpu.core_type = #tpu.core_type<tc>, window_params = [{transform_indices = @transform_0, window_bounds = array<i64: 24, 64>}, {pipeline_mode = #tpu.pipeline_mode<synchronous>, transform_indices = @transform_1, window_bounds = array<i64: 1, 64>}, {pipeline_mode = #tpu.pipeline_mode<synchronous>, transform_indices = @transform_2, window_bounds = array<i64: 1, 64>}, {pipeline_mode = #tpu.pipeline_mode<synchronous>, transform_indices = @transform_3, window_bounds = array<i64: 64, 32>}, {pipeline_mode = #tpu.pipeline_mode<synchronous>, transform_indices = @transform_4, window_bounds = array<i64: 1, 32>}, {transform_indices = @transform_5, window_bounds = array<i64: 24, 32>}]} {
    %c0 = arith.constant 0 : index
    %c0_0 = arith.constant 0 : index
    %0 = vector.load %arg1[%c0, %c0_0] : memref<24x64xbf16, #tpu.memory_space<vmem>>, vector<24x64xbf16>
    %1 = arith.extf %0 : vector<24x64xbf16> to vector<24x64xf32>
    %cst = arith.constant dense<0.000000e+00> : vector<24xf32>
    %2 = vector.multi_reduction <add>, %1, %cst [1] : vector<24x64xf32> to vector<24xf32>
    %3 = vector.shape_cast %2 : vector<24xf32> to vector<24x1xf32>
    %cst_1 = arith.constant 6.400000e+01 : f32
    %4 = vector.broadcast %cst_1 : f32 to vector<24x1xf32>
    %5 = arith.divf %3, %4 : vector<24x1xf32>
    %6 = vector.broadcast %5 : vector<24x1xf32> to vector<24x64xf32>
    %7 = arith.subf %1, %6 : vector<24x64xf32>
    %8 = arith.mulf %7, %7 : vector<24x64xf32>
    %cst_2 = arith.constant dense<0.000000e+00> : vector<24xf32>
    %9 = vector.multi_reduction <add>, %8, %cst_2 [1] : vector<24x64xf32> to vector<24xf32>
    %10 = vector.shape_cast %9 : vector<24xf32> to vector<24x1xf32>
    %cst_3 = arith.constant 6.400000e+01 : f32
    %11 = vector.broadcast %cst_3 : f32 to vector<24x1xf32>
    %12 = arith.divf %10, %11 : vector<24x1xf32>
    %cst_4 = arith.constant 9.99999974E-6 : f32
    %13 = vector.broadcast %cst_4 : f32 to vector<24x1xf32>
    %14 = arith.addf %12, %13 : vector<24x1xf32>
    %15 = math.rsqrt %14 : vector<24x1xf32>
    %16 = vector.broadcast %15 : vector<24x1xf32> to vector<24x64xf32>
    %17 = arith.mulf %7, %16 : vector<24x64xf32>
    %c0_5 = arith.constant 0 : index
    %c0_6 = arith.constant 0 : index
    %18 = vector.load %arg2[%c0_5, %c0_6] : memref<1x64xf32, #tpu.memory_space<vmem>>, vector<1x64xf32>
    %19 = vector.broadcast %18 : vector<1x64xf32> to vector<24x64xf32>
    %20 = arith.mulf %17, %19 : vector<24x64xf32>
    %c0_7 = arith.constant 0 : index
    %c0_8 = arith.constant 0 : index
    %21 = vector.load %arg3[%c0_7, %c0_8] : memref<1x64xf32, #tpu.memory_space<vmem>>, vector<1x64xf32>
    %22 = vector.broadcast %21 : vector<1x64xf32> to vector<24x64xf32>
    %23 = arith.addf %20, %22 : vector<24x64xf32>
    %24 = arith.truncf %23 : vector<24x64xf32> to vector<24x64xbf16>
    %c0_9 = arith.constant 0 : index
    %c0_10 = arith.constant 0 : index
    %25 = vector.load %arg4[%c0_9, %c0_10] : memref<64x32xbf16, #tpu.memory_space<vmem>>, vector<64x32xbf16>
    %cst_11 = arith.constant dense<0.000000e+00> : vector<24x32xf32>
    %26 = tpu.matmul %24, %25, %cst_11 {dimension_numbers = #tpu.dot_dimension_numbers<[1], [0], [0], [1], [0, 0, 1, 1], [], []>} : vector<24x64xbf16>, vector<64x32xbf16>, vector<24x32xf32> -> vector<24x32xf32>
    %c0_12 = arith.constant 0 : index
    %c0_13 = arith.constant 0 : index
    %27 = vector.load %arg5[%c0_12, %c0_13] : memref<1x32xf32, #tpu.memory_space<vmem>>, vector<1x32xf32>
    %28 = vector.broadcast %27 : vector<1x32xf32> to vector<24x32xf32>
    %29 = arith.addf %26, %28 : vector<24x32xf32>
    %c0_14 = arith.constant 0 : index
    %c0_15 = arith.constant 0 : index
    %30 = vector.load %arg6[%c0_14, %c0_15] : memref<24x32xf32, #tpu.memory_space<vmem>>, vector<24x32xf32>
    tpu.vector_store %arg6[%c0_14, %c0_15], %29 {strides = array<i32>} : memref<24x32xf32, #tpu.memory_space<vmem>>, vector<24x32xf32>,
    return
  }
  func.func @transform_0(%arg0: i32) -> (i32, i32) {
    %c0_i32 = arith.constant 0 : i32
    %c0_i32_0 = arith.constant 0 : i32
    return %arg0, %c0_i32 : i32, i32
  }
  func.func @transform_1(%arg0: i32) -> (i32, i32) {
    %c0_i32 = arith.constant 0 : i32
    %c0_i32_0 = arith.constant 0 : i32
    %c0_i32_1 = arith.constant 0 : i32
    return %c0_i32, %c0_i32_0 : i32, i32
  }
  func.func @transform_2(%arg0: i32) -> (i32, i32) {
    %c0_i32 = arith.constant 0 : i32
    %c0_i32_0 = arith.constant 0 : i32
    %c0_i32_1 = arith.constant 0 : i32
    return %c0_i32, %c0_i32_0 : i32, i32
  }
  func.func @transform_3(%arg0: i32) -> (i32, i32) {
    %c0_i32 = arith.constant 0 : i32
    %c0_i32_0 = arith.constant 0 : i32
    %c0_i32_1 = arith.constant 0 : i32
    return %c0_i32, %c0_i32_0 : i32, i32
  }
  func.func @transform_4(%arg0: i32) -> (i32, i32) {
    %c0_i32 = arith.constant 0 : i32
    %c0_i32_0 = arith.constant 0 : i32
    %c0_i32_1 = arith.constant 0 : i32
    return %c0_i32, %c0_i32_0 : i32, i32
  }
  func.func @transform_5(%arg0: i32) -> (i32, i32) {
    %c0_i32 = arith.constant 0 : i32
    %c0_i32_0 = arith.constant 0 : i32
    return %arg0, %c0_i32 : i32, i32
  }
}

module attributes {stable_mosaic.version = 11 : i64} {
  func.func @_segmerge_kernel(%arg0: i32, %arg1: memref<24x64xbf16, #tpu.memory_space<vmem>>, %arg2: memref<1x64xf32, #tpu.memory_space<vmem>>, %arg3: memref<1x64xf32, #tpu.memory_space<vmem>>, %arg4: memref<64x32xbf16, #tpu.memory_space<vmem>>, %arg5: memref<1x32xf32, #tpu.memory_space<vmem>>, %arg6: memref<24x32xf32, #tpu.memory_space<vmem>>) attributes {dimension_semantics = [#tpu.dimension_semantics<parallel>], iteration_bounds = array<i64: 2>, scalar_prefetch = 0 : i64, scratch_operands = 0 : i64, tpu.core_type = #tpu.core_type<tc>, window_params = [{transform_indices = @transform_0, window_bounds = array<i64: 24, 64>}, {pipeline_mode = #tpu.pipeline_mode<synchronous>, transform_indices = @transform_1, window_bounds = array<i64: 1, 64>}, {pipeline_mode = #tpu.pipeline_mode<synchronous>, transform_indices = @transform_2, window_bounds = array<i64: 1, 64>}, {pipeline_mode = #tpu.pipeline_mode<synchronous>, transform_indices = @transform_3, window_bounds = array<i64: 64, 32>}, {pipeline_mode = #tpu.pipeline_mode<synchronous>, transform_indices = @transform_4, window_bounds = array<i64: 1, 32>}, {transform_indices = @transform_5, window_bounds = array<i64: 24, 32>}]} {
    %c0 = arith.constant 0 : index
    %c0_0 = arith.constant 0 : index
    %0 = vector.load %arg1[%c0, %c0_0] : memref<24x64xbf16, #tpu.memory_space<vmem>>, vector<24x64xbf16>
    %1 = arith.extf %0 : vector<24x64xbf16> to vector<24x64xf32>
    %cst = arith.constant dense<0.000000e+00> : vector<24xf32>
    %2 = vector.multi_reduction <add>, %1, %cst [1] : vector<24x64xf32> to vector<24xf32>
    %3 = vector.shape_cast %2 : vector<24xf32> to vector<24x1xf32>
    %cst_1 = arith.constant 6.400000e+01 : f32
    %4 = vector.broadcast %cst_1 : f32 to vector<24x1xf32>
    %5 = arith.divf %3, %4 : vector<24x1xf32>
    %6 = vector.broadcast %5 : vector<24x1xf32> to vector<24x64xf32>
    %7 = arith.subf %1, %6 : vector<24x64xf32>
    %8 = arith.mulf %7, %7 : vector<24x64xf32>
    %cst_2 = arith.constant dense<0.000000e+00> : vector<24xf32>
    %9 = vector.multi_reduction <add>, %8, %cst_2 [1] : vector<24x64xf32> to vector<24xf32>
    %10 = vector.shape_cast %9 : vector<24xf32> to vector<24x1xf32>
    %cst_3 = arith.constant 6.400000e+01 : f32
    %11 = vector.broadcast %cst_3 : f32 to vector<24x1xf32>
    %12 = arith.divf %10, %11 : vector<24x1xf32>
    %cst_4 = arith.constant 9.99999974E-6 : f32
    %13 = vector.broadcast %cst_4 : f32 to vector<24x1xf32>
    %14 = arith.addf %12, %13 : vector<24x1xf32>
    %15 = math.rsqrt %14 : vector<24x1xf32>
    %16 = vector.broadcast %15 : vector<24x1xf32> to vector<24x64xf32>
    %17 = arith.mulf %7, %16 : vector<24x64xf32>
    %c0_5 = arith.constant 0 : index
    %c0_6 = arith.constant 0 : index
    %18 = vector.load %arg2[%c0_5, %c0_6] : memref<1x64xf32, #tpu.memory_space<vmem>>, vector<1x64xf32>
    %19 = vector.broadcast %18 : vector<1x64xf32> to vector<24x64xf32>
    %20 = arith.mulf %17, %19 : vector<24x64xf32>
    %c0_7 = arith.constant 0 : index
    %c0_8 = arith.constant 0 : index
    %21 = vector.load %arg3[%c0_7, %c0_8] : memref<1x64xf32, #tpu.memory_space<vmem>>, vector<1x64xf32>
    %22 = vector.broadcast %21 : vector<1x64xf32> to vector<24x64xf32>
    %23 = arith.addf %20, %22 : vector<24x64xf32>
    %24 = arith.truncf %23 : vector<24x64xf32> to vector<24x64xbf16>
    %c0_9 = arith.constant 0 : index
    %c0_10 = arith.constant 0 : index
    %25 = vector.load %arg4[%c0_9, %c0_10] : memref<64x32xbf16, #tpu.memory_space<vmem>>, vector<64x32xbf16>
    %cst_11 = arith.constant dense<0.000000e+00> : vector<24x32xf32>
    %26 = tpu.matmul %24, %25, %cst_11 {dimension_numbers = #tpu.dot_dimension_numbers<[1], [0], [0], [1], [0, 0, 1, 1], [], []>} : vector<24x64xbf16>, vector<64x32xbf16>, vector<24x32xf32> -> vector<24x32xf32>
    %c0_12 = arith.constant 0 : index
    %c0_13 = arith.constant 0 : index
    %27 = vector.load %arg5[%c0_12, %c0_13] : memref<1x32xf32, #tpu.memory_space<vmem>>, vector<1x32xf32>
    %28 = vector.broadcast %27 : vector<1x32xf32> to vector<24x32xf32>
    %29 = arith.addf %26, %28 : vector<24x32xf32>
    %c0_14 = arith.constant 0 : index
    %c0_15 = arith.constant 0 : index
    %30 = vector.load %arg6[%c0_14, %c0_15] : memref<24x32xf32, #tpu.memory_space<vmem>>, vector<24x32xf32>
    tpu.vector_store %arg6[%c0_14, %c0_15], %29 {strides = array<i32>} : memref<24x32xf32, #tpu.memory_space<vmem>>, vector<24x32xf32>,
    return
  }
  func.func @transform_0(%arg0: i32) -> (i32, i32) {
    %c0_i32 = arith.constant 0 : i32
    %c0_i32_0 = arith.constant 0 : i32
    return %arg0, %c0_i32 : i32, i32
  }
  func.func @transform_1(%arg0: i32) -> (i32, i32) {
    %c0_i32 = arith.constant 0 : i32
    %c0_i32_0 = arith.constant 0 : i32
    %c0_i32_1 = arith.constant 0 : i32
    return %c0_i32, %c0_i32_0 : i32, i32
  }
  func.func @transform_2(%arg0: i32) -> (i32, i32) {
    %c0_i32 = arith.constant 0 : i32
    %c0_i32_0 = arith.constant 0 : i32
    %c0_i32_1 = arith.constant 0 : i32
    return %c0_i32, %c0_i32_0 : i32, i32
  }
  func.func @transform_3(%arg0: i32) -> (i32, i32) {
    %c0_i32 = arith.constant 0 : i32
    %c0_i32_0 = arith.constant 0 : i32
    %c0_i32_1 = arith.constant 0 : i32
    return %c0_i32, %c0_i32_0 : i32, i32
  }
  func.func @transform_4(%arg0: i32) -> (i32, i32) {
    %c0_i32 = arith.constant 0 : i32
    %c0_i32_0 = arith.constant 0 : i32
    %c0_i32_1 = arith.constant 0 : i32
    return %c0_i32, %c0_i32_0 : i32, i32
  }
  func.func @transform_5(%arg0: i32) -> (i32, i32) {
    %c0_i32 = arith.constant 0 : i32
    %c0_i32_0 = arith.constant 0 : i32
    return %arg0, %c0_i32 : i32, i32
  }
}

</mosaic_0001>

<bundles_post_ra>
// kernel: tpu_custom_call.1
= control target key start
LH: loop header
LB: loop body
LE: loop exit
PB: predicated region body
PF: predicated region fallthrough
CT: control target
= control target key end

     0   :  { %s908_s18 = smov 0   ;;  %s910_s19 = smov 0   ;;  %s1025_s0 = inlined_call_operand.vmem [shape: bf16[40,64], index: 0, kind: input, shape index: {}]   ;;  %s1026_s1 = inlined_call_operand.vmem [shape: f32[1,64], index: 1, kind: input, shape index: {}]   ;;  %s1027_s2 = inlined_call_operand.vmem [shape: f32[1,64], index: 2, kind: input, shape index: {}]   ;;  %s1028_s3 = inlined_call_operand.vmem [shape: bf16[64,32], index: 3, kind: input, shape index: {}]   ;;  %s1029_s4 = inlined_call_operand.vmem [shape: f32[1,32], index: 4, kind: input, shape index: {}]   ;;  %s1030_s5 = inlined_call_operand.vmem [shape: f32[40,32], index: 5, kind: output, shape index: {}]  }
   0x1   :  { %s912_s20 = smov 0  }
   0x2 LB: > { %s921_s21 = sadd.s32 4294967295, %s843_s20   ;;  %s923_s22 = sadd.s32 1, %s843_s20   ;;  %s843_s20 = sphi %s912_s20, %s1034_s20   ;;  %s839_s19 = sphi %s910_s19, %s1033_s19   ;;  %s835_s18 = sphi %s908_s18, %s1032_s18  }
   0x3   : > { %s129_s23 = ssub.s32 %s843_s20, %s923_s22  ;;  %s132_s24 = sadd.s32 1, %s839_s19 }
   0x4   : > { %p130_p0 = scmp.eq.s32.totalorder %s129_s23, 0  ;;  %p142_p1 = scmp.ne.s32.totalorder %s839_s19, %s835_s18 }
   0x5   : > { %p143_p2 = scmp.eq.s32.totalorder %s921_s21, 1  ;;  %p636_p3 = scmp.ge.s32.totalorder %s843_s20, 1 }
   0x6   : > { %s931_s25 = scalar_select %p130_p0, %s839_s19, %s132_s24  }
   0x7   : > { %p933_p4 = por %p143_p2, %p142_p1  ;;  %p196_p5 = scmp.lt.s32.totalorder %s843_s20, 3 }
   0x9   : > { %p197_p6 = pnand %p636_p3, %p196_p5 }
   0xa   : > { %s938_s27 = smul.u32 (!%p197_p6), 3, %s921_s21  ;;  %s224_s24 = sand.u32 (!%p197_p6), 1, %s835_s18  }
   0xb   : > { %200 = sbr.rel (%p197_p6) target bundleno = 497 (0x1f1), region = 40 }
   0xc   : > { %p232_p7 = scmp.lt.s32.totalorder (!%p197_p6), %s938_s27, 4 }
  0x10   : > { %s233_s28 = scalar_select %p232_p7, %s938_s27, 4  ;;  %vm253_vm0 = vcmask 523264   ;;  %v877_v8 = vmov 64.0   ;;  %v671_v30 = vld [vmem:[%s1028_s3 + $0x18] sm:$0xff]  ;;  %v670_v31 = vld [vmem:[%s1028_s3 + $0x10] sm:$0xff]  ;;  %v669_v32 = vld [vmem:[%s1028_s3 + $0x8] sm:$0xff] }
  0x11   : > { %775 = vrcp.f32 %v877_v8  ;;  %389 = vmatpush.bf16.msra.mxu0 %v671_v30  ;;  %677 = vmatpush.bf16.msra.mxu1 %v671_v30  ;;  %v668_v35 = vld [vmem:[%s1028_s3] sm:$0xff]  ;;  %vm403_vm11 = vcmask 261120   ;;  %s415_s18 = ssub.s32 (%p933_p4), 5, %s938_s27 }
  0x12   : > { %s637_s29 = sshll.u32 %s233_s28, 2  ;;  %v772_v57 = vld [vmem:[%s1026_s1] ss:$0 sm:$0xff]  ;;  %s681_s28 = smul.u32 24, %s224_s24 }
  0x13   : > { %s235_s7 = scalar_lea.vmem %s1025_s0, %s637_s29  ;;  %p416_p8 = scmp.lt.s32.totalorder (%p933_p4), %s415_s18, 3 }
  0x14   : > { %v674_v0 = vld [vmem:[%s235_s7] sm:$0xff]   ;;  %v249_v1 = vld [vmem:[%s235_s7 + $0x8] sm:$0xf]  ;;  %s980_s6 = scalar_lea.vmem [#allocation2], %s681_s28   ;;  %s672_s7 = smul.u32 (%p933_p4), 24, %s921_s21 }
  0x15   : > { %v675_v2 = vunpack.c.l.bf16 %v674_v0  ;;  %v252_v3 = vunpack.c.l.bf16 %v249_v1  ;;  %v676_v6 = vunpack.c.h.bf16 %v674_v0  ;;  %390 = vmatpush.bf16.msra.mxu0 %v670_v31  ;;  %678 = vmatpush.bf16.msra.mxu1 %v670_v31  ;;  %v773_v0 = vld [vmem:[%s1027_s2] ss:$0 sm:$0xff] }
  0x16   : > { %s992_s10 = scalar_lea.vmem (%p933_p4), %s1030_s5, %s672_s7  }
  0x17   : > { %v254_v4 = vsel %vm253_vm0, %v675_v2, 0.0  ;;  %v260_v5 = vsel %vm253_vm0, %v252_v3, 0.0  ;;  %v257_v7 = vsel %vm253_vm0, %v676_v6, 0.0  ;;  %v776_v9 = vpop.eup %775 }
  0x18   : > { %255 = vadd.xlane.f32.xlu0 %v254_v4  ;;  %261 = vadd.xlane.f32.xlu1 %v260_v5  ;;  %v264_v10 = vmul.f32 64.0, %v776_v9  ;;  %vm268_vm1 = vweird.f32 %v776_v9 }
  0x19   : > { %391 = vmatpush.bf16.msra.mxu0 %v669_v32  ;;  %679 = vmatpush.bf16.msra.mxu1 %v669_v32 }
  0x1a   : > { %v265_v11 = vsub.f32 1.0, %v264_v10 }
  0x1c   : > { %v266_v12 = vmul.f32 %v776_v9, %v265_v11 }
  0x1d   : > { %392 = vmatpush.bf16.msra.mxu0 %v668_v35  ;;  %680 = vmatpush.bf16.msra.mxu1 %v668_v35 }
  0x1e   : > { %v267_v13 = vadd.f32 %v776_v9, %v266_v12 }
  0x20   : > { %258 = vadd.xlane.f32.xlu0 %v257_v7  ;;  %v269_v14 = vsel %vm268_vm1, %v776_v9, %v267_v13  ;;  %v774_v13 = vld [vmem:[%s1029_s4] ss:$0 sm:$0xff] }
  0x8b   : > { %v256_v15 = vpop.xlane.xlu0 %255  ;;  %v262_v19 = vpop.xlane.xlu1 %261 }
  0x8c   : > { %v270_v16 = vmul.f32 %v269_v14, %v256_v15  ;;  %v272_v23 = vmul.f32 %v269_v14, %v262_v19 }
  0x8e   : > { %v273_v17 = vsub.f32 %v675_v2, %v270_v16  ;;  %v949_v25 = vsub.f32 %v252_v3, %v272_v23 }
  0x90   : > { %v276_v18 = vmul.f32 %v273_v17, %v273_v17  ;;  %v278_v28 = vmul.f32 %v949_v25, %v949_v25 }
  0x92   : > { %v279_v20 = vsel %vm253_vm0, %v276_v18, 0.0  ;;  %v285_v29 = vsel %vm253_vm0, %v278_v28, 0.0 }
  0x93   : > { %280 = vadd.xlane.f32.xlu1 %v279_v20  ;;  %v259_v21 = vpop.xlane.xlu0 %258 }
  0x94   : > { %v271_v22 = vmul.f32 %v269_v14, %v259_v21 }
  0x96   : > { %v274_v24 = vsub.f32 %v676_v6, %v271_v22 }
  0x98   : > { %v277_v26 = vmul.f32 %v274_v24, %v274_v24 }
  0x9a   : > { %v282_v27 = vsel %vm253_vm0, %v277_v26, 0.0 }
  0x9b   : > { %283 = vadd.xlane.f32.xlu2 %v282_v27 }
  0xa3   : > { %286 = vadd.xlane.f32.xlu2 %v285_v29 }
 0x106   : > { %v281_v33 = vpop.xlane.xlu1 %280 }
 0x107   : > { %v288_v34 = vmul.f32 %v281_v33, %v269_v14 }
 0x109   : > { %v291_v36 = vadd.f32 1e-05, %v288_v34 }
 0x10b   : > { %777 = vrsqrt.f32 %v291_v36  ;;  %vm300_vm3 = vweird.f32 %v291_v36 }
 0x10e   : > { %v284_v37 = vpop.xlane.xlu2 %283 }
 0x10f   : > { %v289_v38 = vmul.f32 %v284_v37, %v269_v14 }
 0x111   : > { %v778_v39 = vpop.eup %777  ;;  %v292_v40 = vadd.f32 1e-05, %v289_v38 }
 0x112   : > { %v295_v41 = vmul.f32 %v778_v39, %v291_v36  ;;  %vm301_vm2 = vweird.f32 %v778_v39 }
 0x113   : > { %779 = vrsqrt.f32 %v292_v40  ;;  %vm302_vm4 = vmor %vm300_vm3, %vm301_vm2  ;;  %vm310_vm6 = vweird.f32 %v292_v40 }
 0x114   : > { %v296_v42 = vmul.f32 %v778_v39, %v295_v41 }
 0x116   : > { %v297_v43 = vmul.f32 0.5, %v296_v42  ;;  %v287_v44 = vpop.xlane.xlu2 %286 }
 0x117   : > { %v290_v45 = vmul.f32 %v287_v44, %v269_v14 }
 0x118   : > { %v298_v46 = vsub.f32 1.5, %v297_v43 }
 0x119   : > { %v780_v47 = vpop.eup %779  ;;  %v293_v48 = vadd.f32 1e-05, %v290_v45 }
 0x11a   : > { %v299_v49 = vmul.f32 %v778_v39, %v298_v46  ;;  %v305_v50 = vmul.f32 %v780_v47, %v292_v40  ;;  %vm311_vm5 = vweird.f32 %v780_v47 }
 0x11b   : > { %781 = vrsqrt.f32 %v293_v48  ;;  %vm312_vm7 = vmor %vm310_vm6, %vm311_vm5  ;;  %vm320_vm9 = vweird.f32 %v293_v48 }
 0x11c   : > { %v306_v51 = vmul.f32 %v780_v47, %v305_v50  ;;  %v303_v52 = vsel %vm302_vm4, %v778_v39, %v299_v49 }
 0x11d   : > { %v324_v56 = vmul.f32 %v303_v52, %v273_v17 }
 0x11e   : > { %v307_v53 = vmul.f32 0.5, %v306_v51 }
 0x11f   : > { %v331_v63 = vmul.f32 %v772_v57, %v324_v56 }
 0x120   : > { %v308_v54 = vsub.f32 1.5, %v307_v53 }
 0x121   : > { %v782_v55 = vpop.eup %781  ;;  %v338_v4 = vadd.f32 %v773_v0, %v331_v63 }
 0x122   : > { %v309_v58 = vmul.f32 %v780_v47, %v308_v54  ;;  %v315_v59 = vmul.f32 %v782_v55, %v293_v48  ;;  %vm321_vm8 = vweird.f32 %v782_v55 }
 0x123   : > { %vm322_vm10 = vmor %vm320_vm9, %vm321_vm8 }
 0x124   : > { %v313_v60 = vsel %vm312_vm7, %v780_v47, %v309_v58  ;;  %v316_v61 = vmul.f32 %v782_v55, %v315_v59 }
 0x125   : > { %v325_v62 = vmul.f32 %v313_v60, %v274_v24 }
 0x126   : > { %v317_v1 = vmul.f32 0.5, %v316_v61 }
 0x127   : > { %v332_v2 = vmul.f32 %v772_v57, %v325_v62 }
 0x128   : > { %v318_v3 = vsub.f32 1.5, %v317_v1 }
 0x129   : > { %v339_v5 = vadd.f32 %v773_v0, %v332_v2 }
 0x12a   : > { %v319_v6 = vmul.f32 %v782_v55, %v318_v3 }
 0x12b   : > { %v341_v7 = vpack.c.bf16 %v339_v5, %v338_v4 }
 0x12c   : > { %v323_v8 = vsel %vm322_vm10, %v782_v55, %v319_v6 }
 0x12d   : > { %654 = vmatmul.msk.bf16.vlgmr.msra.gmra.mxu0 %vm253_vm0, %v341_v7  ;;  %v326_v9 = vmul.f32 %v323_v8, %v949_v25 }
 0x12f   : > { %v333_v10 = vmul.f32 %v772_v57, %v326_v9 }
 0x131   : > { %v340_v11 = vadd.f32 %v773_v0, %v333_v10 }
 0x133   : > { %v342_v12 = vpack.c.bf16 %v340_v11, %v340_v11 }
 0x135   : > { %655 = vmatmul.msk.bf16.vlgmr.msra.gmra.mxu1 %vm253_vm0, %v342_v12 }
 0x1aa   : > { %v394_v14 = vpop.f32.mrf.mxu0 }
 0x1ab   : > { %v395_v15 = vadd.f32 %v774_v13, %v394_v14 }
 0x1ad   : > { %404 = vst.msk [vmem:[%s980_s6] sm:$0xff] %vm403_vm11, %v395_v15 }
 0x1b2   : > { %v396_v16 = vpop.f32.mrf.mxu0  ;;  %v399_v17 = vpop.f32.mrf.mxu1 }
 0x1b3   : > { %v397_v18 = vadd.f32 %v774_v13, %v396_v16  ;;  %v400_v19 = vadd.f32 %v774_v13, %v399_v17 }
 0x1b5   : > { %405 = vst.msk [vmem:[%s980_s6 + $0x8] sm:$0xff] %vm403_vm11, %v397_v18 }
 0x1b6   : > { %406 = vst.msk [vmem:[%s980_s6 + $0x10] sm:$0xff] %vm403_vm11, %v400_v19  ;;  %413 = sbr.rel (!%p933_p4) target bundleno = 497 (0x1f1), region = 44 }
 0x1ba   : > { %v401_v20 = vpop.f32.mrf.mxu1 }
 0x1bb   : > { %s1036_s18 = smov (!%p416_p8, %s415_s18), 3 }
 0x1bc   : > { %s656_s11 = sshll.u32 %s1036_s18, 3 }
 0x1bd   : > { %p659_p9 = scmp.eq.s32.totalorder %s656_s11, 0 }
 0x1be   : > { %783 = sdivrem.u32 (!%p659_p9), %s1036_s18, 3 }
 0x1bf   : > { %424 = sbr.rel (%p659_p9) target bundleno = 497 (0x1f1), region = 48 }
 0x1c7   : > { %s998_s26 = spop.drf %783 }
 0x1c8   : > { %s785_s12 = spop.drf %783  ;;  %p660_p10 = scmp.le.s32.totalorder %s998_s26, 0 }
 0x1c9   : > { %s845_s21 = smov (!%p660_p10), %s992_s10   ;;  %s849_s27 = smov (!%p660_p10), %s980_s6  }
 0x1ca   : > { %589 = sbr.rel (%p660_p10) target bundleno = 471 (0x1d7), region = 124  ;;  %s853_s13 = smov (!%p660_p10), 0  }
 0x1cb   : > { %s857_s14 = smov (!%p660_p10), 0  }
 0x1cf LB: >> { %v493_v21 = vld [vmem:[%s851_s27] sm:$0xff]  ;;  %v495_v22 = vld [vmem:[%s851_s27 + $0x8] sm:$0xff]  ;;  %v497_v23 = vld [vmem:[%s851_s27 + $0x10] sm:$0xff]  ;;  %s499_s15 = sadd.s32 1, %s855_s13  ;;  %s487_s14 = sadd.s32 1, %s859_s14   ;;  %s859_s14 = sphi %s857_s14, %s487_s14   ;;  %s855_s13 = sphi %s853_s13, %s854_s13   ;;  %s851_s27 = sphi %s849_s27, %s504_s27   ;;  %s847_s21 = sphi %s845_s21, %s505_s21  }
 0x1d0   : >> { %494 = vst [vmem:[%s847_s21] sm:$0xff] %v493_v21  ;;  %p500_p11 = scmp.ge.s32.totalorder %s499_s15, %s998_s26  ;;  %p486_p12 = scmp.ge.s32.totalorder %s487_s14, %s998_s26 }
 0x1d1   : >> { %496 = vst [vmem:[%s847_s21 + $0x8] sm:$0xff] %v495_v22 }
 0x1d2   : >> { %498 = vst [vmem:[%s847_s21 + $0x10] sm:$0xff] %v497_v23  ;;  %s1038_s15 = smov (%p500_p11, %s499_s15), 0  ;;  %489 = sbr.rel (!%p486_p12) target bundleno = 463 (0x1cf), region = 130 }
 0x1d3   : >> { %s502_s16 = smul.u32 24, %s1038_s15  ;;  %s854_s13 = smov %s1038_s15  }
 0x1d5   : >> { %s504_s27 = scalar_lea.vmem %s980_s6, %s502_s16 [#allocation2]   ;;  %s505_s21 = scalar_lea.vmem %s992_s10, %s502_s16  }
 0x1d7 PF: > { %786 = sdivrem.u32 %s1036_s18, 3 }
 0x1d8   : > { %s661_s17 = smul.u32 24, %s998_s26 }
 0x1da   : > { %s1010_s20 = scalar_lea.vmem %s980_s6, %s661_s17 [#allocation2]   ;;  %s512_s23 = scalar_lea.vmem %s992_s10, %s661_s17  }
 0x1e0   : > { %s787_s24 = spop.drf %786 }
 0x1e1   : > { %s788_s28 = spop.drf %786 }
 0x1e2   : > { %p663_p13 = scmp.le.s32.totalorder %s788_s28, 0 }
 0x1e3   : > { %s861_s29 = smov (!%p663_p13), %s512_s23   ;;  %s865_s30 = smov (!%p663_p13), %s1010_s20  }
 0x1e4   : > { %603 = sbr.rel (%p663_p13) target bundleno = 497 (0x1f1), region = 135  ;;  %s869_s7 = smov (!%p663_p13), 0  }
 0x1e5   : > { %s873_s8 = smov (!%p663_p13), 0  }
 0x1e9 LB: >> { %v522_v24 = vld [vmem:[%s867_s30] sm:$0xff]  ;;  %s524_s6 = sadd.s32 1, %s871_s7  ;;  %s516_s8 = sadd.s32 1, %s875_s8   ;;  %s875_s8 = sphi %s873_s8, %s516_s8   ;;  %s871_s7 = sphi %s869_s7, %s870_s7   ;;  %s867_s30 = sphi %s865_s30, %s529_s30   ;;  %s863_s29 = sphi %s861_s29, %s530_s29  }
 0x1ea   : >> { %523 = vst [vmem:[%s863_s29] sm:$0xff] %v522_v24  ;;  %p525_p0 = scmp.ge.s32.totalorder %s524_s6, %s788_s28  ;;  %p515_p1 = scmp.ge.s32.totalorder %s516_s8, %s788_s28 }
 0x1ec   : >> { %s1040_s6 = smov (%p525_p0, %s524_s6), 0  ;;  %518 = sbr.rel (!%p515_p1) target bundleno = 489 (0x1e9), region = 141 }
 0x1ed   : >> { %s664_s18 = sshll.u32 %s1040_s6, 3  ;;  %s870_s7 = smov %s1040_s6  }
 0x1ee   : >> { %s529_s30 = scalar_lea.vmem %s1010_s20, %s664_s18 [#allocation2]   ;;  %s530_s29 = scalar_lea.vmem %s512_s23, %s664_s18  }
 0x1f1 PF: > { %p12_p2 = scmp.ge.s32.totalorder %s923_s22, 4   ;;  %s1032_s18 = smov %s839_s19 }
 0x1f2   : > { %s1033_s19 = smov %s931_s25  ;;  %s1034_s20 = smov %s923_s22 }
 0x1f3   :  { %14 = sbr.rel (!%p12_p2) target bundleno = 2 (0x2), region = 152 }

// kernel: tpu_custom_call.1
= control target key start
LH: loop header
LB: loop body
LE: loop exit
PB: predicated region body
PF: predicated region fallthrough
CT: control target
= control target key end

     0   :  { %s908_s18 = smov 0   ;;  %s910_s19 = smov 0   ;;  %s1025_s0 = inlined_call_operand.vmem [shape: bf16[40,64], index: 0, kind: input, shape index: {}]   ;;  %s1026_s1 = inlined_call_operand.vmem [shape: f32[1,64], index: 1, kind: input, shape index: {}]   ;;  %s1027_s2 = inlined_call_operand.vmem [shape: f32[1,64], index: 2, kind: input, shape index: {}]   ;;  %s1028_s3 = inlined_call_operand.vmem [shape: bf16[64,32], index: 3, kind: input, shape index: {}]   ;;  %s1029_s4 = inlined_call_operand.vmem [shape: f32[1,32], index: 4, kind: input, shape index: {}]   ;;  %s1030_s5 = inlined_call_operand.vmem [shape: f32[40,32], index: 5, kind: output, shape index: {}]  }
   0x1   :  { %s912_s20 = smov 0  }
   0x2 LB: > { %s921_s21 = sadd.s32 4294967295, %s843_s20   ;;  %s923_s22 = sadd.s32 1, %s843_s20   ;;  %s843_s20 = sphi %s912_s20, %s1034_s20   ;;  %s839_s19 = sphi %s910_s19, %s1033_s19   ;;  %s835_s18 = sphi %s908_s18, %s1032_s18  }
   0x3   : > { %s129_s23 = ssub.s32 %s843_s20, %s923_s22  ;;  %s132_s24 = sadd.s32 1, %s839_s19 }
   0x4   : > { %p130_p0 = scmp.eq.s32.totalorder %s129_s23, 0  ;;  %p142_p1 = scmp.ne.s32.totalorder %s839_s19, %s835_s18 }
   0x5   : > { %p143_p2 = scmp.eq.s32.totalorder %s921_s21, 1  ;;  %p636_p3 = scmp.ge.s32.totalorder %s843_s20, 1 }
   0x6   : > { %s931_s25 = scalar_select %p130_p0, %s839_s19, %s132_s24  }
   0x7   : > { %p933_p4 = por %p143_p2, %p142_p1  ;;  %p196_p5 = scmp.lt.s32.totalorder %s843_s20, 3 }
   0x9   : > { %p197_p6 = pnand %p636_p3, %p196_p5 }
   0xa   : > { %s938_s27 = smul.u32 (!%p197_p6), 3, %s921_s21  ;;  %s224_s24 = sand.u32 (!%p197_p6), 1, %s835_s18  }
   0xb   : > { %200 = sbr.rel (%p197_p6) target bundleno = 497 (0x1f1), region = 40 }
   0xc   : > { %p232_p7 = scmp.lt.s32.totalorder (!%p197_p6), %s938_s27, 4 }
  0x10   : > { %s233_s28 = scalar_select %p232_p7, %s938_s27, 4  ;;  %vm253_vm0 = vcmask 523264   ;;  %v877_v8 = vmov 64.0   ;;  %v671_v30 = vld [vmem:[%s1028_s3 + $0x18] sm:$0xff]  ;;  %v670_v31 = vld [vmem:[%s1028_s3 + $0x10] sm:$0xff]  ;;  %v669_v32 = vld [vmem:[%s1028_s3 + $0x8] sm:$0xff] }
  0x11   : > { %775 = vrcp.f32 %v877_v8  ;;  %389 = vmatpush.bf16.msra.mxu0 %v671_v30  ;;  %677 = vmatpush.bf16.msra.mxu1 %v671_v30  ;;  %v668_v35 = vld [vmem:[%s1028_s3] sm:$0xff]  ;;  %vm403_vm11 = vcmask 261120   ;;  %s415_s18 = ssub.s32 (%p933_p4), 5, %s938_s27 }
  0x12   : > { %s637_s29 = sshll.u32 %s233_s28, 2  ;;  %v772_v57 = vld [vmem:[%s1026_s1] ss:$0 sm:$0xff]  ;;  %s681_s28 = smul.u32 24, %s224_s24 }
  0x13   : > { %s235_s7 = scalar_lea.vmem %s1025_s0, %s637_s29  ;;  %p416_p8 = scmp.lt.s32.totalorder (%p933_p4), %s415_s18, 3 }
  0x14   : > { %v674_v0 = vld [vmem:[%s235_s7] sm:$0xff]   ;;  %v249_v1 = vld [vmem:[%s235_s7 + $0x8] sm:$0xf]  ;;  %s980_s6 = scalar_lea.vmem [#allocation2], %s681_s28   ;;  %s672_s7 = smul.u32 (%p933_p4), 24, %s921_s21 }
  0x15   : > { %v675_v2 = vunpack.c.l.bf16 %v674_v0  ;;  %v252_v3 = vunpack.c.l.bf16 %v249_v1  ;;  %v676_v6 = vunpack.c.h.bf16 %v674_v0  ;;  %390 = vmatpush.bf16.msra.mxu0 %v670_v31  ;;  %678 = vmatpush.bf16.msra.mxu1 %v670_v31  ;;  %v773_v0 = vld [vmem:[%s1027_s2] ss:$0 sm:$0xff] }
  0x16   : > { %s992_s10 = scalar_lea.vmem (%p933_p4), %s1030_s5, %s672_s7  }
  0x17   : > { %v254_v4 = vsel %vm253_vm0, %v675_v2, 0.0  ;;  %v260_v5 = vsel %vm253_vm0, %v252_v3, 0.0  ;;  %v257_v7 = vsel %vm253_vm0, %v676_v6, 0.0  ;;  %v776_v9 = vpop.eup %775 }
  0x18   : > { %255 = vadd.xlane.f32.xlu0 %v254_v4  ;;  %261 = vadd.xlane.f32.xlu1 %v260_v5  ;;  %v264_v10 = vmul.f32 64.0, %v776_v9  ;;  %vm268_vm1 = vweird.f32 %v776_v9 }
  0x19   : > { %391 = vmatpush.bf16.msra.mxu0 %v669_v32  ;;  %679 = vmatpush.bf16.msra.mxu1 %v669_v32 }
  0x1a   : > { %v265_v11 = vsub.f32 1.0, %v264_v10 }
  0x1c   : > { %v266_v12 = vmul.f32 %v776_v9, %v265_v11 }
  0x1d   : > { %392 = vmatpush.bf16.msra.mxu0 %v668_v35  ;;  %680 = vmatpush.bf16.msra.mxu1 %v668_v35 }
  0x1e   : > { %v267_v13 = vadd.f32 %v776_v9, %v266_v12 }
  0x20   : > { %258 = vadd.xlane.f32.xlu0 %v257_v7  ;;  %v269_v14 = vsel %vm268_vm1, %v776_v9, %v267_v13  ;;  %v774_v13 = vld [vmem:[%s1029_s4] ss:$0 sm:$0xff] }
  0x8b   : > { %v256_v15 = vpop.xlane.xlu0 %255  ;;  %v262_v19 = vpop.xlane.xlu1 %261 }
  0x8c   : > { %v270_v16 = vmul.f32 %v269_v14, %v256_v15  ;;  %v272_v23 = vmul.f32 %v269_v14, %v262_v19 }
  0x8e   : > { %v273_v17 = vsub.f32 %v675_v2, %v270_v16  ;;  %v949_v25 = vsub.f32 %v252_v3, %v272_v23 }
  0x90   : > { %v276_v18 = vmul.f32 %v273_v17, %v273_v17  ;;  %v278_v28 = vmul.f32 %v949_v25, %v949_v25 }
  0x92   : > { %v279_v20 = vsel %vm253_vm0, %v276_v18, 0.0  ;;  %v285_v29 = vsel %vm253_vm0, %v278_v28, 0.0 }
  0x93   : > { %280 = vadd.xlane.f32.xlu1 %v279_v20  ;;  %v259_v21 = vpop.xlane.xlu0 %258 }
  0x94   : > { %v271_v22 = vmul.f32 %v269_v14, %v259_v21 }
  0x96   : > { %v274_v24 = vsub.f32 %v676_v6, %v271_v22 }
  0x98   : > { %v277_v26 = vmul.f32 %v274_v24, %v274_v24 }
  0x9a   : > { %v282_v27 = vsel %vm253_vm0, %v277_v26, 0.0 }
  0x9b   : > { %283 = vadd.xlane.f32.xlu2 %v282_v27 }
  0xa3   : > { %286 = vadd.xlane.f32.xlu2 %v285_v29 }
 0x106   : > { %v281_v33 = vpop.xlane.xlu1 %280 }
 0x107   : > { %v288_v34 = vmul.f32 %v281_v33, %v269_v14 }
 0x109   : > { %v291_v36 = vadd.f32 1e-05, %v288_v34 }
 0x10b   : > { %777 = vrsqrt.f32 %v291_v36  ;;  %vm300_vm3 = vweird.f32 %v291_v36 }
 0x10e   : > { %v284_v37 = vpop.xlane.xlu2 %283 }
 0x10f   : > { %v289_v38 = vmul.f32 %v284_v37, %v269_v14 }
 0x111   : > { %v778_v39 = vpop.eup %777  ;;  %v292_v40 = vadd.f32 1e-05, %v289_v38 }
 0x112   : > { %v295_v41 = vmul.f32 %v778_v39, %v291_v36  ;;  %vm301_vm2 = vweird.f32 %v778_v39 }
 0x113   : > { %779 = vrsqrt.f32 %v292_v40  ;;  %vm302_vm4 = vmor %vm300_vm3, %vm301_vm2  ;;  %vm310_vm6 = vweird.f32 %v292_v40 }
 0x114   : > { %v296_v42 = vmul.f32 %v778_v39, %v295_v41 }
 0x116   : > { %v297_v43 = vmul.f32 0.5, %v296_v42  ;;  %v287_v44 = vpop.xlane.xlu2 %286 }
 0x117   : > { %v290_v45 = vmul.f32 %v287_v44, %v269_v14 }
 0x118   : > { %v298_v46 = vsub.f32 1.5, %v297_v43 }
 0x119   : > { %v780_v47 = vpop.eup %779  ;;  %v293_v48 = vadd.f32 1e-05, %v290_v45 }
 0x11a   : > { %v299_v49 = vmul.f32 %v778_v39, %v298_v46  ;;  %v305_v50 = vmul.f32 %v780_v47, %v292_v40  ;;  %vm311_vm5 = vweird.f32 %v780_v47 }
 0x11b   : > { %781 = vrsqrt.f32 %v293_v48  ;;  %vm312_vm7 = vmor %vm310_vm6, %vm311_vm5  ;;  %vm320_vm9 = vweird.f32 %v293_v48 }
 0x11c   : > { %v306_v51 = vmul.f32 %v780_v47, %v305_v50  ;;  %v303_v52 = vsel %vm302_vm4, %v778_v39, %v299_v49 }
 0x11d   : > { %v324_v56 = vmul.f32 %v303_v52, %v273_v17 }
 0x11e   : > { %v307_v53 = vmul.f32 0.5, %v306_v51 }
 0x11f   : > { %v331_v63 = vmul.f32 %v772_v57, %v324_v56 }
 0x120   : > { %v308_v54 = vsub.f32 1.5, %v307_v53 }
 0x121   : > { %v782_v55 = vpop.eup %781  ;;  %v338_v4 = vadd.f32 %v773_v0, %v331_v63 }
 0x122   : > { %v309_v58 = vmul.f32 %v780_v47, %v308_v54  ;;  %v315_v59 = vmul.f32 %v782_v55, %v293_v48  ;;  %vm321_vm8 = vweird.f32 %v782_v55 }
 0x123   : > { %vm322_vm10 = vmor %vm320_vm9, %vm321_vm8 }
 0x124   : > { %v313_v60 = vsel %vm312_vm7, %v780_v47, %v309_v58  ;;  %v316_v61 = vmul.f32 %v782_v55, %v315_v59 }
 0x125   : > { %v325_v62 = vmul.f32 %v313_v60, %v274_v24 }
 0x126   : > { %v317_v1 = vmul.f32 0.5, %v316_v61 }
 0x127   : > { %v332_v2 = vmul.f32 %v772_v57, %v325_v62 }
 0x128   : > { %v318_v3 = vsub.f32 1.5, %v317_v1 }
 0x129   : > { %v339_v5 = vadd.f32 %v773_v0, %v332_v2 }
 0x12a   : > { %v319_v6 = vmul.f32 %v782_v55, %v318_v3 }
 0x12b   : > { %v341_v7 = vpack.c.bf16 %v339_v5, %v338_v4 }
 0x12c   : > { %v323_v8 = vsel %vm322_vm10, %v782_v55, %v319_v6 }
 0x12d   : > { %654 = vmatmul.msk.bf16.vlgmr.msra.gmra.mxu0 %vm253_vm0, %v341_v7  ;;  %v326_v9 = vmul.f32 %v323_v8, %v949_v25 }
 0x12f   : > { %v333_v10 = vmul.f32 %v772_v57, %v326_v9 }
 0x131   : > { %v340_v11 = vadd.f32 %v773_v0, %v333_v10 }
 0x133   : > { %v342_v12 = vpack.c.bf16 %v340_v11, %v340_v11 }
 0x135   : > { %655 = vmatmul.msk.bf16.vlgmr.msra.gmra.mxu1 %vm253_vm0, %v342_v12 }
 0x1aa   : > { %v394_v14 = vpop.f32.mrf.mxu0 }
 0x1ab   : > { %v395_v15 = vadd.f32 %v774_v13, %v394_v14 }
 0x1ad   : > { %404 = vst.msk [vmem:[%s980_s6] sm:$0xff] %vm403_vm11, %v395_v15 }
 0x1b2   : > { %v396_v16 = vpop.f32.mrf.mxu0  ;;  %v399_v17 = vpop.f32.mrf.mxu1 }
 0x1b3   : > { %v397_v18 = vadd.f32 %v774_v13, %v396_v16  ;;  %v400_v19 = vadd.f32 %v774_v13, %v399_v17 }
 0x1b5   : > { %405 = vst.msk [vmem:[%s980_s6 + $0x8] sm:$0xff] %vm403_vm11, %v397_v18 }
 0x1b6   : > { %406 = vst.msk [vmem:[%s980_s6 + $0x10] sm:$0xff] %vm403_vm11, %v400_v19  ;;  %413 = sbr.rel (!%p933_p4) target bundleno = 497 (0x1f1), region = 44 }
 0x1ba   : > { %v401_v20 = vpop.f32.mrf.mxu1 }
 0x1bb   : > { %s1036_s18 = smov (!%p416_p8, %s415_s18), 3 }
 0x1bc   : > { %s656_s11 = sshll.u32 %s1036_s18, 3 }
 0x1bd   : > { %p659_p9 = scmp.eq.s32.totalorder %s656_s11, 0 }
 0x1be   : > { %783 = sdivrem.u32 (!%p659_p9), %s1036_s18, 3 }
 0x1bf   : > { %424 = sbr.rel (%p659_p9) target bundleno = 497 (0x1f1), region = 48 }
 0x1c7   : > { %s998_s26 = spop.drf %783 }
 0x1c8   : > { %s785_s12 = spop.drf %783  ;;  %p660_p10 = scmp.le.s32.totalorder %s998_s26, 0 }
 0x1c9   : > { %s845_s21 = smov (!%p660_p10), %s992_s10   ;;  %s849_s27 = smov (!%p660_p10), %s980_s6  }
 0x1ca   : > { %589 = sbr.rel (%p660_p10) target bundleno = 471 (0x1d7), region = 124  ;;  %s853_s13 = smov (!%p660_p10), 0  }
 0x1cb   : > { %s857_s14 = smov (!%p660_p10), 0  }
 0x1cf LB: >> { %v493_v21 = vld [vmem:[%s851_s27] sm:$0xff]  ;;  %v495_v22 = vld [vmem:[%s851_s27 + $0x8] sm:$0xff]  ;;  %v497_v23 = vld [vmem:[%s851_s27 + $0x10] sm:$0xff]  ;;  %s499_s15 = sadd.s32 1, %s855_s13  ;;  %s487_s14 = sadd.s32 1, %s859_s14   ;;  %s859_s14 = sphi %s857_s14, %s487_s14   ;;  %s855_s13 = sphi %s853_s13, %s854_s13   ;;  %s851_s27 = sphi %s849_s27, %s504_s27   ;;  %s847_s21 = sphi %s845_s21, %s505_s21  }
 0x1d0   : >> { %494 = vst [vmem:[%s847_s21] sm:$0xff] %v493_v21  ;;  %p500_p11 = scmp.ge.s32.totalorder %s499_s15, %s998_s26  ;;  %p486_p12 = scmp.ge.s32.totalorder %s487_s14, %s998_s26 }
 0x1d1   : >> { %496 = vst [vmem:[%s847_s21 + $0x8] sm:$0xff] %v495_v22 }
 0x1d2   : >> { %498 = vst [vmem:[%s847_s21 + $0x10] sm:$0xff] %v497_v23  ;;  %s1038_s15 = smov (%p500_p11, %s499_s15), 0  ;;  %489 = sbr.rel (!%p486_p12) target bundleno = 463 (0x1cf), region = 130 }
 0x1d3   : >> { %s502_s16 = smul.u32 24, %s1038_s15  ;;  %s854_s13 = smov %s1038_s15  }
 0x1d5   : >> { %s504_s27 = scalar_lea.vmem %s980_s6, %s502_s16 [#allocation2]   ;;  %s505_s21 = scalar_lea.vmem %s992_s10, %s502_s16  }
 0x1d7 PF: > { %786 = sdivrem.u32 %s1036_s18, 3 }
 0x1d8   : > { %s661_s17 = smul.u32 24, %s998_s26 }
 0x1da   : > { %s1010_s20 = scalar_lea.vmem %s980_s6, %s661_s17 [#allocation2]   ;;  %s512_s23 = scalar_lea.vmem %s992_s10, %s661_s17  }
 0x1e0   : > { %s787_s24 = spop.drf %786 }
 0x1e1   : > { %s788_s28 = spop.drf %786 }
 0x1e2   : > { %p663_p13 = scmp.le.s32.totalorder %s788_s28, 0 }
 0x1e3   : > { %s861_s29 = smov (!%p663_p13), %s512_s23   ;;  %s865_s30 = smov (!%p663_p13), %s1010_s20  }
 0x1e4   : > { %603 = sbr.rel (%p663_p13) target bundleno = 497 (0x1f1), region = 135  ;;  %s869_s7 = smov (!%p663_p13), 0  }
 0x1e5   : > { %s873_s8 = smov (!%p663_p13), 0  }
 0x1e9 LB: >> { %v522_v24 = vld [vmem:[%s867_s30] sm:$0xff]  ;;  %s524_s6 = sadd.s32 1, %s871_s7  ;;  %s516_s8 = sadd.s32 1, %s875_s8   ;;  %s875_s8 = sphi %s873_s8, %s516_s8   ;;  %s871_s7 = sphi %s869_s7, %s870_s7   ;;  %s867_s30 = sphi %s865_s30, %s529_s30   ;;  %s863_s29 = sphi %s861_s29, %s530_s29  }
 0x1ea   : >> { %523 = vst [vmem:[%s863_s29] sm:$0xff] %v522_v24  ;;  %p525_p0 = scmp.ge.s32.totalorder %s524_s6, %s788_s28  ;;  %p515_p1 = scmp.ge.s32.totalorder %s516_s8, %s788_s28 }
 0x1ec   : >> { %s1040_s6 = smov (%p525_p0, %s524_s6), 0  ;;  %518 = sbr.rel (!%p515_p1) target bundleno = 489 (0x1e9), region = 141 }
 0x1ed   : >> { %s664_s18 = sshll.u32 %s1040_s6, 3  ;;  %s870_s7 = smov %s1040_s6  }
 0x1ee   : >> { %s529_s30 = scalar_lea.vmem %s1010_s20, %s664_s18 [#allocation2]   ;;  %s530_s29 = scalar_lea.vmem %s512_s23, %s664_s18  }
 0x1f1 PF: > { %p12_p2 = scmp.ge.s32.totalorder %s923_s22, 4   ;;  %s1032_s18 = smov %s839_s19 }
 0x1f2   : > { %s1033_s19 = smov %s931_s25  ;;  %s1034_s20 = smov %s923_s22 }
 0x1f3   :  { %14 = sbr.rel (!%p12_p2) target bundleno = 2 (0x2), region = 152 }

</bundles_post_ra>
